<compile_context>
chip_gen: v5e
topology: v5e:2x2
jax: 0.10.0
libtpu: 0.0.40
codegen_flags: <defaults>
</compile_context>

<pallas_src>
import functools
import math

import jax
import jax.numpy as jnp
from jax.experimental import pallas as pl
from jax.experimental.pallas import tpu as pltpu


def _round_up(x, m):
    return ((x + m - 1) // m) * m


def _patch_proj_kernel(p_ref, w_ref, b_ref, o_ref):
    # p_ref: (TM, Kp)  patch tile (compute dtype, e.g. bf16)
    # w_ref: (Kp, Op)  projection weight (VMEM-resident across the whole grid)
    # b_ref: (1,  Op)  f32 bias
    # o_ref: (TM, Op)  output tile (x.dtype)
    acc = jnp.dot(p_ref[...], w_ref[...], preferred_element_type=jnp.float32)
    o_ref[...] = (acc + b_ref[...]).astype(o_ref.dtype)


def prepare_patch_params(weight, bias, compute_dtype=jnp.bfloat16):
    """One-time prep: conv weight (O,C,P,P) -> padded (Kp,Op) matmul weight."""
    O, C, P, _ = weight.shape
    K = P * P * C
    Kp = _round_up(K, 128)
    Op = _round_up(O, 128)
    # (O, C, kh, kw) -> (kh, kw, C, O) -> (K, O); zero-pad K and O to 128-mults.
    w_mat = weight.transpose(2, 3, 1, 0).reshape(K, O).astype(compute_dtype)
    w_mat = jnp.pad(w_mat, ((0, Kp - K), (0, Op - O)))
    b_mat = jnp.pad(bias.astype(jnp.float32), (0, Op - O)).reshape(1, Op)
    return w_mat, b_mat


def image_patch_encoding_prepared(x, w_mat, b_mat, out_channels, patch_size,
                                  compute_dtype=jnp.bfloat16, tm_max=512):
    """x: (B,H,W,C); w_mat: (Kp,Op) prepared; returns (B, Hp*Wp, O) in x.dtype."""
    B, H, W, C = x.shape
    P = patch_size
    O = out_channels
    assert H % P == 0 and W % P == 0
    Hp, Wp = H // P, W // P
    K = P * P * C
    Kp, Op = w_mat.shape
    N = B * Hp * Wp

    # Patch extraction: one XLA pass over the activations, already in the
    # (cheaper) compute dtype. Feature order (kh, kw, c).
    patches = x.astype(compute_dtype).reshape(B, Hp, P, Wp, P, C)
    patches = patches.transpose(0, 1, 3, 2, 4, 5).reshape(N, K)

    cd_bytes = jnp.dtype(compute_dtype).itemsize
    out_bytes = jnp.dtype(x.dtype).itemsize
    # Row alignment: bf16 packs 16 rows / vreg, f32 output needs 8.
    row_align = 16 if cd_bytes == 2 else 8
    TM = min(tm_max, _round_up(N, row_align))
    Np = _round_up(N, TM)

    if Np > N or Kp > K:
        patches = jnp.pad(patches, ((0, Np - N), (0, Kp - K)))

    # VMEM budget: double-buffered in/out tiles + resident weight + bias.
    vmem_bytes = (2 * TM * Kp * cd_bytes
                  + 2 * TM * Op * out_bytes
                  + 2 * Kp * Op * cd_bytes
                  + 2 * 8 * Op * 4)
    vmem_limit = int(vmem_bytes * 1.5) + (2 << 20)
    vmem_limit = max(16 << 20, min(vmem_limit, 48 << 20))  # safe on v5e..v7x

    out = pl.pallas_call(
        _patch_proj_kernel,
        out_shape=jax.ShapeDtypeStruct((Np, Op), x.dtype),
        grid_spec=pltpu.PrefetchScalarGridSpec(
            num_scalar_prefetch=0,
            grid=(Np // TM,),
            in_specs=[
                pl.BlockSpec((TM, Kp), lambda i: (i, 0)),   # streamed patch tiles
                pl.BlockSpec((Kp, Op), lambda i: (0, 0)),   # resident weight
                pl.BlockSpec((1, Op), lambda i: (0, 0)),    # resident bias
            ],
            out_specs=pl.BlockSpec((TM, Op), lambda i: (i, 0)),
        ),
        compiler_params=pltpu.CompilerParams(
            dimension_semantics=("parallel",),   # megacore-sharded on v7x
            vmem_limit_bytes=vmem_limit),
    )(patches, w_mat, b_mat)

    # Drop row / channel padding, restore (B, Hp*Wp, O).
    return out[:N, :O].reshape(B, Hp * Wp, O)


def image_patch_encoding(x, weight, bias, patch_size,
                         compute_dtype=jnp.bfloat16, tm_max=512):
    """Convenience wrapper taking the raw conv weight (O, C, P, P) and bias (O,)."""
    w_mat, b_mat = prepare_patch_params(weight, bias, compute_dtype)
    return image_patch_encoding_prepared(
        x, w_mat, b_mat, weight.shape[0], patch_size,
        compute_dtype=compute_dtype, tm_max=tm_max)


def init_params(key, in_channels, out_channels, patch_size):
    """Deterministic init matching nn.Conv2d default (kaiming uniform)."""
    kw, kb = jax.random.split(key)
    fan_in = in_channels * patch_size * patch_size
    bound = 1.0 / math.sqrt(fan_in)
    weight = jax.random.uniform(
        kw, (out_channels, in_channels, patch_size, patch_size),
        minval=-bound, maxval=bound, dtype=jnp.float32)
    bias = jax.random.uniform(
        kb, (out_channels,), minval=-bound, maxval=bound, dtype=jnp.float32)
    return weight, bias


if __name__ == "__main__":
    # Small shapes consistent with the module's forward (x is NHWC; the module
    # permutes to NCHW internally).
    B, H, W, C = 2, 16, 16, 4
    patch_size = 4
    out_channels = 32

    key = jax.random.PRNGKey(0)
    kx, kp = jax.random.split(key)
    x = jax.random.normal(kx, (B, H, W, C), dtype=jnp.float32)
    weight, bias = init_params(kp, C, out_channels, patch_size)

    # Prepare the matmul weight once (param-load time), then jit the forward.
    w_mat, b_mat = prepare_patch_params(weight, bias)
    fn = jax.jit(functools.partial(
        image_patch_encoding_prepared,
        out_channels=out_channels, patch_size=patch_size))
    out = fn(x, w_mat, b_mat)
    jax.block_until_ready(out)

    # Reference: plain-JAX conv with the same semantics (f32).
    ref = jax.lax.conv_general_dilated(
        x.transpose(0, 3, 1, 2), weight,
        window_strides=(patch_size, patch_size), padding="VALID")
    ref = ref + bias[None, :, None, None]
    ref = ref.transpose(0, 2, 3, 1).reshape(B, -1, out_channels)

    assert out.shape == (B, (H // patch_size) * (W // patch_size), out_channels)
    # bf16 inputs / f32 accumulation -> loosened tolerance vs the f32 conv.
    assert jnp.allclose(out, ref, atol=5e-2, rtol=5e-2), (
        float(jnp.max(jnp.abs(out - ref))))

    print("KERNEL_OK")
</pallas_src>

<mosaic_0001>
module attributes {stable_mosaic.version = 11 : i64} {
  func.func @_patch_proj_kernel(%arg0: i32, %arg1: memref<32x128xbf16, #tpu.memory_space<vmem>>, %arg2: memref<128x128xbf16, #tpu.memory_space<vmem>>, %arg3: memref<1x128xf32, #tpu.memory_space<vmem>>, %arg4: memref<32x128xf32, #tpu.memory_space<vmem>>) attributes {dimension_semantics = [#tpu.dimension_semantics<parallel>], iteration_bounds = array<i64: 1>, scalar_prefetch = 0 : i64, scratch_operands = 0 : i64, tpu.core_type = #tpu.core_type<tc>, window_params = [{transform_indices = @transform_0, window_bounds = array<i64: 32, 128>}, {pipeline_mode = #tpu.pipeline_mode<synchronous>, transform_indices = @transform_1, window_bounds = array<i64: 128, 128>}, {pipeline_mode = #tpu.pipeline_mode<synchronous>, transform_indices = @transform_2, window_bounds = array<i64: 1, 128>}, {transform_indices = @transform_3, window_bounds = array<i64: 32, 128>}]} {
    %c0 = arith.constant 0 : index
    %c0_0 = arith.constant 0 : index
    %0 = vector.load %arg1[%c0, %c0_0] : memref<32x128xbf16, #tpu.memory_space<vmem>>, vector<32x128xbf16>
    %c0_1 = arith.constant 0 : index
    %c0_2 = arith.constant 0 : index
    %1 = vector.load %arg2[%c0_1, %c0_2] : memref<128x128xbf16, #tpu.memory_space<vmem>>, vector<128x128xbf16>
    %cst = arith.constant dense<0.000000e+00> : vector<32x128xf32>
    %2 = tpu.matmul %0, %1, %cst {dimension_numbers = #tpu.dot_dimension_numbers<[1], [0], [0], [1], [0, 0, 1, 1], [], []>} : vector<32x128xbf16>, vector<128x128xbf16>, vector<32x128xf32> -> vector<32x128xf32>
    %c0_3 = arith.constant 0 : index
    %c0_4 = arith.constant 0 : index
    %3 = vector.load %arg3[%c0_3, %c0_4] : memref<1x128xf32, #tpu.memory_space<vmem>>, vector<1x128xf32>
    %4 = vector.broadcast %3 : vector<1x128xf32> to vector<32x128xf32>
    %5 = arith.addf %2, %4 : vector<32x128xf32>
    %c0_5 = arith.constant 0 : index
    %c0_6 = arith.constant 0 : index
    %6 = vector.load %arg4[%c0_5, %c0_6] : memref<32x128xf32, #tpu.memory_space<vmem>>, vector<32x128xf32>
    tpu.vector_store %arg4[%c0_5, %c0_6], %5 {strides = array<i32>} : memref<32x128xf32, #tpu.memory_space<vmem>>, vector<32x128xf32>,
    return
  }
  func.func @transform_0(%arg0: i32) -> (i32, i32) {
    %c0_i32 = arith.constant 0 : i32
    %c0_i32_0 = arith.constant 0 : i32
    return %arg0, %c0_i32 : i32, i32
  }
  func.func @transform_1(%arg0: i32) -> (i32, i32) {
    %c0_i32 = arith.constant 0 : i32
    %c0_i32_0 = arith.constant 0 : i32
    %c0_i32_1 = arith.constant 0 : i32
    return %c0_i32, %c0_i32_0 : i32, i32
  }
  func.func @transform_2(%arg0: i32) -> (i32, i32) {
    %c0_i32 = arith.constant 0 : i32
    %c0_i32_0 = arith.constant 0 : i32
    %c0_i32_1 = arith.constant 0 : i32
    return %c0_i32, %c0_i32_0 : i32, i32
  }
  func.func @transform_3(%arg0: i32) -> (i32, i32) {
    %c0_i32 = arith.constant 0 : i32
    %c0_i32_0 = arith.constant 0 : i32
    return %arg0, %c0_i32 : i32, i32
  }
}

</mosaic_0001>

<bundles_post_ra>
// kernel: image_patch_encoding_prepared.1
= control target key start
LH: loop header
LB: loop body
LE: loop exit
PB: predicated region body
PF: predicated region fallthrough
CT: control target
= control target key end

     0   :  { %s287_s0 = inlined_call_operand.vmem [shape: bf16[32,128], index: 0, kind: input, shape index: {}]   ;;  %s288_s1 = inlined_call_operand.vmem [shape: bf16[128,128], index: 1, kind: input, shape index: {}]   ;;  %s289_s2 = inlined_call_operand.vmem [shape: f32[1,128], index: 2, kind: input, shape index: {}]   ;;  %s290_s3 = inlined_call_operand.hbm [shape: f32[32,128], index: 3, kind: output, shape index: {}]  }
   0x1   :  { %v189_v0 = vld [vmem:[%s288_s1 + $0x38] sm:$0xff]  ;;  %v188_v1 = vld [vmem:[%s288_s1 + $0x30] sm:$0xff] }
   0x2   :  { %99 = vmatpush.bf16.msra.mxu0 %v189_v0  ;;  %190 = vmatpush.bf16.msra.mxu1 %v189_v0 }
   0x3   :  { %8 = vsyncpa [#allocation3], 0  ;;  %v187_v2 = vld [vmem:[%s288_s1 + $0x28] sm:$0xff]  ;;  %v186_v3 = vld [vmem:[%s288_s1 + $0x20] sm:$0xff]  ;;  %s230_s10 = smov 8  }
   0x4   :  { %v185_v4 = vld [vmem:[%s288_s1 + $0x18] sm:$0xff]  ;;  %v184_v5 = vld [vmem:[%s288_s1 + $0x10] sm:$0xff]  ;;  %v183_v6 = vld [vmem:[%s288_s1 + $0x8] sm:$0xff] }
   0x5   :  { %v182_v7 = vld [vmem:[%s288_s1] sm:$0xff]  ;;  %v181_v9 = vld [vmem:[%s287_s0 + $0x8] sm:$0xff]  ;;  %s228_s1 = smov [#allocation2]  }
   0x6   :  { %100 = vmatpush.bf16.msra.mxu0 %v188_v1  ;;  %191 = vmatpush.bf16.msra.mxu1 %v188_v1  ;;  %v180_v8 = vld [vmem:[%s287_s0] sm:$0xff]  ;;  %s126_s7 = sshll.u32 %s228_s1, 4  ;;  %s128_s0 = sshll.u32 %s290_s3, 4  ;;  %s127_s7 = int_to_ptr.vmem [resolvable:$true] %s126_s7  ;;  %s129_s0 = int_to_ptr.hbm [resolvable:$true] %s128_s0 }
   0x7   :  { %v201_v10 = vld [vmem:[%s289_s2] ss:$0 sm:$0xff]  ;;  %s229_s2 = smov 128  }
   0xa   :  { %101 = vmatpush.bf16.msra.mxu0 %v187_v2  ;;  %192 = vmatpush.bf16.msra.mxu1 %v187_v2 }
   0xe   :  { %102 = vmatpush.bf16.msra.mxu0 %v186_v3  ;;  %193 = vmatpush.bf16.msra.mxu1 %v186_v3 }
  0x12   :  { %103 = vmatpush.bf16.msra.mxu0 %v185_v4  ;;  %194 = vmatpush.bf16.msra.mxu1 %v185_v4 }
  0x16   :  { %104 = vmatpush.bf16.msra.mxu0 %v184_v5  ;;  %195 = vmatpush.bf16.msra.mxu1 %v184_v5 }
  0x1a   :  { %105 = vmatpush.bf16.msra.mxu0 %v183_v6  ;;  %196 = vmatpush.bf16.msra.mxu1 %v183_v6 }
  0x1e   :  { %106 = vmatpush.bf16.msra.mxu0 %v182_v7  ;;  %197 = vmatpush.bf16.msra.mxu1 %v182_v7 }
  0x21   :  { %107 = vmatmul.bf16.vlgmr.msra.gmra.mxu0 %v180_v8  ;;  %112 = vmatmul.bf16.vlgmr.msra.gmra.mxu1 %v181_v9 }
  0x9e   :  { %v108_v11 = vpop.f32.mrf.mxu0  ;;  %v113_v12 = vpop.f32.mrf.mxu1 }
  0x9f   :  { %v109_v13 = vadd.f32 %v201_v10, %v108_v11  ;;  %v114_v14 = vadd.f32 %v201_v10, %v113_v12 }
  0xa1   :  { %118 = vst [vmem:[#allocation2] sm:$0xff] %v109_v13 }
  0xa2   :  { %120 = vst [vmem:[#allocation2 + $0x10] sm:$0xff] %v114_v14 }
  0xa6   :  { %v110_v15 = vpop.f32.mrf.mxu0  ;;  %v115_v16 = vpop.f32.mrf.mxu1 }
  0xa7   :  { %v111_v17 = vadd.f32 %v201_v10, %v110_v15  ;;  %v116_v18 = vadd.f32 %v201_v10, %v115_v16 }
  0xa9   :  { %119 = vst [vmem:[#allocation2 + $0x8] sm:$0xff] %v111_v17 }
  0xaa   :  { %121 = vst [vmem:[#allocation2 + $0x18] sm:$0xff] %v116_v18 }
  0xab   :  { %134 = dma.vmem_to_hbm [thread:$0]  %s127_s7, 512, %s129_s0, [#allocation3], %s229_s2, %s229_s2, %s230_s10  }
  0xac   :  { %226 = dma.done.wait [#allocation3], 512  }
  0xad   :  { %227 = vsyncadd [#allocation3], 4294966784 }
  0xae   :  { %139 = vsyncpa [#allocation3], 1 }

</bundles_post_ra>
